<compile_context>
chip_gen: v5e
topology: v5e:2x2
jax: 0.10.0
libtpu: 0.0.40
codegen_flags: <defaults>
</compile_context>

<pallas_src>
import math

import jax
import jax.numpy as jnp
from jax import lax
from jax.experimental import pallas as pl
from jax.experimental.pallas import tpu as pltpu

_LANE = 128       # vreg lane width
_SUBLANE = 8      # f32 vreg sublane count

_INV_SQRT2 = 1.0 / math.sqrt(2.0)

# Abramowitz & Stegun 7.1.26:  erf(z) ~= 1 - P(t)*exp(-z^2),  t = 1/(1 + p*z),
# z >= 0, max abs error 1.5e-7.  Here z = |x|/sqrt(2); the 1/sqrt2 scale is
# folded into p and the leading 0.5 of Phi(x) = 0.5*(1+erf(x/sqrt2)) is folded
# into the polynomial coefficients.
_PZ = 0.3275911 * _INV_SQRT2
_C1 = 0.5 * 0.254829592
_C2 = 0.5 * -0.284496736
_C3 = 0.5 * 1.421413741
_C4 = 0.5 * -1.453152027
_C5 = 0.5 * 1.061405429


def _gelu_kernel(x_ref, o_ref):
    x = x_ref[...].astype(jnp.float32)      # f32 compute (v5e VPU/EUP have no bf16)
    ax = jnp.abs(x)
    t = 1.0 / (1.0 + _PZ * ax)              # divide -> EUP recip + Newton refine
    poly = ((((_C5 * t + _C4) * t + _C3) * t + _C2) * t + _C1) * t
    e = jnp.exp(x * x * -0.5)               # EUP slot (free w.r.t. the VPU)
    q = poly * e                            # q = 0.5*(1 - erf(|x|/sqrt2))
    phi = jnp.where(x >= 0.0, 1.0 - q, q)   # Phi(x) = 0.5*(1 + erf(x/sqrt2))
    o_ref[...] = (x * phi).astype(o_ref.dtype)   # store back in source dtype


def _round_up(v: int, m: int) -> int:
    return ((v + m - 1) // m) * m


def gelu_pallas(x: jax.Array, *, block_bytes: int = 6 * 1024 * 1024) -> jax.Array:
    """Exact (erf-based) GELU, elementwise, matching the PyTorch module."""
    orig_shape = x.shape
    dtype = x.dtype
    n = x.size
    if n == 0:
        return x

    itemsize = jnp.dtype(dtype).itemsize

    # Lane-dense flat view.  Zero-copy whenever the flat length is a multiple
    # of 128 and there is at least one full sublane group of rows; otherwise
    # pad the (small) remainder and slice it back off.
    use_view = (n % _LANE == 0) and (n // _LANE >= _SUBLANE)
    if use_view:
        rows = n // _LANE
        x2d = x.reshape(rows, _LANE)                       # pure view (bitcast)
    else:
        # TODO(synk): for large n with n % 128 != 0, handle the <128-elem tail
        # in-kernel (scalar-prefetched length + masked pltpu.store) to avoid
        # this pad/slice round trip.
        rows = max(_SUBLANE, pl.cdiv(n, _LANE))
        total = rows * _LANE
        x2d = jnp.pad(x.reshape(-1), (0, total - n)).reshape(rows, _LANE)

    # Block rows from a byte budget (same bytes for f32 and bf16), multiple of
    # the sublane granule; capped at ~half the rows so the grid has >= 2 steps
    # and both v7x TensorCores get work.  Partial last block is masked.
    tr_budget = max(
        _SUBLANE, (block_bytes // (_LANE * itemsize)) // _SUBLANE * _SUBLANE
    )
    half_rows = _round_up(pl.cdiv(rows, 2), _SUBLANE)
    tr = max(_SUBLANE, min(tr_budget, half_rows))
    grid = (pl.cdiv(rows, tr),)

    # Cost estimate matching the real lowering: ~20 VALU flops/elem for the
    # Phi polynomial + 2 EUP transcendentals (exp, reciprocal).
    cost = pl.CostEstimate(
        flops=20 * n,
        transcendentals=2 * n,
        bytes_accessed=2 * n * itemsize,
    )

    out2d = pl.pallas_call(
        _gelu_kernel,
        out_shape=jax.ShapeDtypeStruct((rows, _LANE), dtype),
        grid_spec=pltpu.PrefetchScalarGridSpec(
            num_scalar_prefetch=0,
            grid=grid,
            # NOTE: if a bundle dump shows exposed DMA-issue latency, sweep
            # pipeline_mode=pl.Buffered(3) on the input spec.
            in_specs=[pl.BlockSpec((tr, _LANE), lambda i: (i, 0))],
            out_specs=pl.BlockSpec((tr, _LANE), lambda i: (i, 0)),
        ),
        compiler_params=pltpu.CompilerParams(
            dimension_semantics=("parallel",),     # megacore split on v7x
            vmem_limit_bytes=32 * 1024 * 1024,     # 2x(in+out) buffers = 24 MiB
        ),
        cost_estimate=cost,
    )(x2d)

    if use_view:
        return out2d.reshape(orig_shape)
    return out2d.reshape(-1)[:n].reshape(orig_shape)


def _gelu_ref(x):
    xf = x.astype(jnp.float32)
    return (xf * 0.5 * (1.0 + lax.erf(xf * _INV_SQRT2))).astype(x.dtype)


if __name__ == "__main__":
    # NCHW activation, matching a typical CNN GELU call: batch=2, channels=4, 16x16.
    x = jax.random.normal(jax.random.PRNGKey(0), (2, 4, 16, 16), dtype=jnp.float32)
    y = jax.block_until_ready(gelu_pallas(x))
    assert y.shape == x.shape and y.dtype == x.dtype
    assert jnp.allclose(y, _gelu_ref(x), atol=1e-5, rtol=1e-5), "f32 mismatch vs reference"

    # Ragged size (945 elems) exercises the pad + partial-block fallback.
    x2 = jax.random.normal(jax.random.PRNGKey(1), (3, 5, 7, 9), dtype=jnp.float32)
    y2 = jax.block_until_ready(gelu_pallas(x2))
    assert jnp.allclose(y2, _gelu_ref(x2), atol=1e-5, rtol=1e-5), "ragged mismatch vs reference"

    # bf16 input: HBM traffic stays bf16-sized, compute upcasts to f32 in-vreg.
    x3 = jax.random.normal(jax.random.PRNGKey(2), (2, 8, 32), dtype=jnp.bfloat16)
    y3 = jax.block_until_ready(gelu_pallas(x3))
    assert y3.shape == x3.shape and y3.dtype == jnp.bfloat16
    assert jnp.allclose(
        y3.astype(jnp.float32), _gelu_ref(x3).astype(jnp.float32),
        atol=1e-2, rtol=1e-2,
    ), "bf16 mismatch vs reference"

    print("KERNEL_OK")
</pallas_src>

<mosaic_0001>
module attributes {stable_mosaic.version = 11 : i64} {
  func.func @_gelu_kernel(%arg0: i32, %arg1: memref<8x128xf32, #tpu.memory_space<vmem>>, %arg2: memref<8x128xf32, #tpu.memory_space<vmem>>) attributes {dimension_semantics = [#tpu.dimension_semantics<parallel>], iteration_bounds = array<i64: 2>, scalar_prefetch = 0 : i64, scratch_operands = 0 : i64, tpu.core_type = #tpu.core_type<tc>, window_params = [{transform_indices = @transform_0, window_bounds = array<i64: 8, 128>}, {transform_indices = @transform_1, window_bounds = array<i64: 8, 128>}]} {
    %c0 = arith.constant 0 : index
    %c0_0 = arith.constant 0 : index
    %0 = vector.load %arg1[%c0, %c0_0] : memref<8x128xf32, #tpu.memory_space<vmem>>, vector<8x128xf32>
    %1 = math.absf %0 : vector<8x128xf32>
    %cst = arith.constant 0.231641889 : f32
    %2 = vector.broadcast %cst : f32 to vector<8x128xf32>
    %3 = arith.mulf %2, %1 : vector<8x128xf32>
    %cst_1 = arith.constant 1.000000e+00 : f32
    %4 = vector.broadcast %cst_1 : f32 to vector<8x128xf32>
    %5 = arith.addf %4, %3 : vector<8x128xf32>
    %cst_2 = arith.constant 1.000000e+00 : f32
    %6 = vector.broadcast %cst_2 : f32 to vector<8x128xf32>
    %7 = arith.divf %6, %5 : vector<8x128xf32>
    %cst_3 = arith.constant 0.53070271 : f32
    %8 = vector.broadcast %cst_3 : f32 to vector<8x128xf32>
    %9 = arith.mulf %8, %7 : vector<8x128xf32>
    %cst_4 = arith.constant -0.72657603 : f32
    %10 = vector.broadcast %cst_4 : f32 to vector<8x128xf32>
    %11 = arith.addf %9, %10 : vector<8x128xf32>
    %12 = arith.mulf %11, %7 : vector<8x128xf32>
    %cst_5 = arith.constant 0.710706889 : f32
    %13 = vector.broadcast %cst_5 : f32 to vector<8x128xf32>
    %14 = arith.addf %12, %13 : vector<8x128xf32>
    %15 = arith.mulf %14, %7 : vector<8x128xf32>
    %cst_6 = arith.constant -0.142248362 : f32
    %16 = vector.broadcast %cst_6 : f32 to vector<8x128xf32>
    %17 = arith.addf %15, %16 : vector<8x128xf32>
    %18 = arith.mulf %17, %7 : vector<8x128xf32>
    %cst_7 = arith.constant 0.127414793 : f32
    %19 = vector.broadcast %cst_7 : f32 to vector<8x128xf32>
    %20 = arith.addf %18, %19 : vector<8x128xf32>
    %21 = arith.mulf %20, %7 : vector<8x128xf32>
    %22 = arith.mulf %0, %0 : vector<8x128xf32>
    %cst_8 = arith.constant -5.000000e-01 : f32
    %23 = vector.broadcast %cst_8 : f32 to vector<8x128xf32>
    %24 = arith.mulf %22, %23 : vector<8x128xf32>
    %25 = math.exp %24 : vector<8x128xf32>
    %26 = arith.mulf %21, %25 : vector<8x128xf32>
    %cst_9 = arith.constant 0.000000e+00 : f32
    %27 = vector.broadcast %cst_9 : f32 to vector<8x128xf32>
    %28 = arith.cmpf oge, %0, %27 : vector<8x128xf32>
    %cst_10 = arith.constant 1.000000e+00 : f32
    %29 = vector.broadcast %cst_10 : f32 to vector<8x128xf32>
    %30 = arith.subf %29, %26 : vector<8x128xf32>
    %31 = arith.select %28, %30, %26 : vector<8x128xi1>, vector<8x128xf32>
    %32 = arith.mulf %0, %31 : vector<8x128xf32>
    %c0_11 = arith.constant 0 : index
    %c0_12 = arith.constant 0 : index
    %33 = vector.load %arg2[%c0_11, %c0_12] : memref<8x128xf32, #tpu.memory_space<vmem>>, vector<8x128xf32>
    tpu.vector_store %arg2[%c0_11, %c0_12], %32 {strides = array<i32>} : memref<8x128xf32, #tpu.memory_space<vmem>>, vector<8x128xf32>,
    return
  }
  func.func @transform_0(%arg0: i32) -> (i32, i32) {
    %c0_i32 = arith.constant 0 : i32
    %c0_i32_0 = arith.constant 0 : i32
    return %arg0, %c0_i32 : i32, i32
  }
  func.func @transform_1(%arg0: i32) -> (i32, i32) {
    %c0_i32 = arith.constant 0 : i32
    %c0_i32_0 = arith.constant 0 : i32
    return %arg0, %c0_i32 : i32, i32
  }
}

</mosaic_0001>

<bundles_post_ra>
// kernel: tpu_custom_call.1
= control target key start
LH: loop header
LB: loop body
LE: loop exit
PB: predicated region body
PF: predicated region fallthrough
CT: control target
= control target key end

     0   :  { %6 = vsyncpa [#allocation3], 0  ;;  %s559_s0 = inlined_call_operand.hbm [shape: f32[16,128], index: 0, kind: input, shape index: {}]   ;;  %s560_s1 = inlined_call_operand.hbm [shape: f32[16,128], index: 1, kind: output, shape index: {}]  }
   0x1   :  { %8 = vsyncpa [#allocation3 + $0x1], 0 }
   0x2   :  { %9 = vsyncpa [#allocation4], 0 }
   0x3   :  { %11 = vsyncpa [#allocation4 + $0x1], 0  ;;  %s428_s6 = smov 0   ;;  %s430_s7 = smov 0  }
   0x4   :  { %s432_s8 = smov 0   ;;  %s434_s9 = smov 0  }
   0x5 LB: > { %s449_s10 = sadd.s32 4294967295, %s416_s9   ;;  %s258_s11 = sadd.s32 4294967294, %s416_s9   ;;  %s416_s9 = sphi %s434_s9, %s570_s9   ;;  %s412_s8 = sphi %s432_s8, %s569_s8   ;;  %s408_s7 = sphi %s430_s7, %s568_s7   ;;  %s404_s6 = sphi %s428_s6, %s567_s6  }
   0x6   : > { %s453_s12 = sadd.s32 1, %s416_s9   ;;  %s24_s13 = sadd.s32 1, %s412_s8 }
   0x7   : > { %s21_s14 = ssub.s32 %s416_s9, %s453_s12  ;;  %p31_p0 = scmp.ne.s32.totalorder %s412_s8, %s408_s7 }
   0x8   : > { %p22_p1 = scmp.eq.s32.totalorder %s21_s14, 0  ;;  %p32_p2 = scmp.eq.s32.totalorder %s416_s9, 0 }
   0x9   : > { %p37_p3 = scmp.ne.s32.totalorder %s408_s7, %s404_s6  ;;  %p38_p4 = scmp.eq.s32.totalorder %s449_s10, 0 }
   0xa   : > { %s465_s15 = scalar_select %p22_p1, %s412_s8, %s24_s13  }
   0xb   : > { %p467_p5 = por %p32_p2, %p31_p0  ;;  %p471_p6 = por %p38_p4, %p37_p3 }
   0xc   : > { %p61_p7 = scmp.eq.s32.totalorder %s449_s10, 1  ;;  %p67_p8 = scmp.eq.s32.totalorder %s258_s11, 1 }
   0xd   : > { %p282_p10 = scmp.lt.s32.totalorder %s416_s9, 2  ;;  %s87_s20 = sand.u32 1, %s412_s8  }
   0xe   : > { %p478_p11 = por %p61_p7, %p31_p0  ;;  %p482_p12 = por %p67_p8, %p37_p3 }
   0xf   : > { %s262_s21 = sshll.u32 %s416_s9, 3  ;;  %s261_s22 = sshll.u32 %s87_s20, 3 }
  0x10   : > { %s95_s25 = scalar_lea.hbm %s559_s0, %s262_s21  ;;  %s91_s27 = scalar_lea.vmem [#allocation2], %s261_s22 }
  0x11   : > { %s97_s26 = sshll.u32 %s95_s25, 4  ;;  %s99_s28 = sshll.u32 %s91_s27, 4  ;;  %s98_s26 = int_to_ptr.hbm [resolvable:$true] %s97_s26  ;;  %s100_s28 = int_to_ptr.vmem [resolvable:$true] %s99_s28 }
  0x12   : > { %p493_p13 = pnand %p282_p10, %p467_p5  ;;  %p263_p0 = scmp.ge.s32.totalorder %s416_s9, 1 }
  0x13   : > { %p104_p1 = scmp.lt.s32.totalorder %s416_s9, 3  ;;  %s88_s30 = scalar_lea.sflag [#allocation3], %s87_s20 }
  0x14   : > { %s320_s2 = sshra.s32 %s98_s26, 4  ;;  %p324_p3 = pneg %p493_p13  ;;  %s321_s2 = int_to_ptr.hbm [resolvable:$true] %s320_s2 }
  0x15   : > { %s322_s3 = scalar_lea.hbm %s321_s2, 8  ;;  %s327_s11 = scalar_lea.hbm %s559_s0, 16 }
  0x16   : > { %p323_p2 = scmp.ne.s32.totalorder %s321_s2, %s322_s3  ;;  %p328_p5 = scmp.lt.s32.totalorder %s321_s2, %s559_s0 }
  0x17   : > { %p329_p8 = scmp.lt.s32.totalorder %s327_s11, %s322_s3 }
  0x18   : > { %p325_p4 = pnand %p324_p3, %p323_p2 }
  0x19   : > { %p330_p10 = por %p329_p8, %p328_p5 }
  0x1a   : > { %p326_p7 = pneg %p325_p4 }
  0x1c   : > { %p331_p9 = pnand %p330_p10, %p326_p7 }
  0x1e   : > { %334 = shalt.err (!%p331_p9)
}
  0x1f   : > { %277 = dma.hbm_to_vmem [thread:$0]  (!%p493_p13), %s98_s26, 128, %s100_s28, %s88_s30  }
  0x20   : > { %p105_p2 = pnand %p263_p0, %p104_p1 }
  0x21   : > { %s514_s16 = sand.u32 (!%p105_p2), 1, %s408_s7  }
  0x22   : > { %108 = sbr.rel (%p105_p2) target bundleno = 92 (0x5c), region = 24  ;;  %s264_s20 = sshll.u32 (!%p105_p2), %s514_s16, 3 }
  0x23   : > { %s111_s21 = scalar_lea.sflag (!%p105_p2), [#allocation3], %s514_s16  ;;  %s114_s22 = scalar_lea.vmem (!%p105_p2), [#allocation2], %s264_s20 }
  0x27   : > { %395 = dma.done.wait (%p471_p6), %s111_s21, 128  }
  0x28   : > { %397 = vsyncadd (%p471_p6), %s111_s21, 4294967168  ;;  %v134_v0 = vld [vmem:[%s114_s22] sm:$0xff]  ;;  %s267_s17 = sshll.u32 %s449_s10, 3  ;;  %s133_s26 = scalar_lea.vmem [#allocation5], %s264_s20 }
  0x29   : > { %v135_v1 = vand.u32 2147483647, %v134_v0  ;;  %v162_v12 = vmul.f32 %v134_v0, %v134_v0  ;;  %s183_s25 = scalar_lea.hbm %s560_s1, %s267_s17  ;;  %vm167_vm4 = vcmp.ge.f32.partialorder %v134_v0, 0.0  ;;  %s185_s27 = sshll.u32 %s133_s26, 4  ;;  %s186_s27 = int_to_ptr.vmem [resolvable:$true] %s185_s27 }
  0x2a   : > { %s187_s28 = sshll.u32 %s183_s25, 4  ;;  %s173_s10 = scalar_lea.sflag [#allocation4], %s514_s16  ;;  %s188_s28 = int_to_ptr.hbm [resolvable:$true] %s187_s28 }
  0x2b   : > { %v136_v2 = vmul.f32 0.23164189, %v135_v1  ;;  %v163_v16 = vmul.f32 -0.5, %v162_v12  ;;  %s364_s29 = sshra.s32 %s188_s28, 4  ;;  %s370_s4 = scalar_lea.hbm %s560_s1, 16  ;;  %s365_s29 = int_to_ptr.hbm [resolvable:$true] %s364_s29 }
  0x2c   : > { %s366_s30 = scalar_lea.hbm %s365_s29, 8  ;;  %p371_p0 = scmp.lt.s32.totalorder %s365_s29, %s560_s1 }
  0x2d   : > { %v137_v3 = vadd.f32 1.0, %v136_v2  ;;  %v164_v19 = vmul.f32 1.442695, %v163_v16  ;;  %p367_p6 = scmp.ne.s32.totalorder %s365_s29, %s366_s30  ;;  %p372_p1 = scmp.lt.s32.totalorder %s370_s4, %s366_s30 }
  0x2f   : > { %316 = vrcp.f32 %v137_v3  ;;  %v149_v6 = vand.u32 2147483648, %v137_v3  ;;  %vm143_vm0 = vweird.f32 %v137_v3  ;;  %v147_v8 = vand.u32 2147483647, %v137_v3  ;;  %p368_p9 = pnand %p367_p6, %p478_p11  ;;  %p373_p3 = por %p372_p1, %p371_p0 }
  0x30   : > { %318 = vpow2.f32 %v164_v19 }
  0x31   : > { %v150_v10 = vor.u32 1.1754944e-38, %v149_v6  ;;  %vm148_vm3 = vcmp.eq.f32.partialorder %v147_v8, 8.507059e+37  ;;  %p369_p13 = pneg %p368_p9 }
  0x33   : > { %p374_p4 = pnand %p373_p3, %p369_p13 }
  0x35   : > { %v317_v4 = vpop.eup %316 }
  0x36   : > { %v139_v5 = vmul.f32 %v317_v4, %v137_v3  ;;  %vm144_vm1 = vweird.f32 %v317_v4  ;;  %v319_v25 = vpop.eup %318 }
  0x37   : > { %vm145_vm2 = vmor %vm143_vm0, %vm144_vm1 }
  0x38   : > { %v140_v7 = vsub.f32 1.0, %v139_v5 }
  0x3a   : > { %v141_v9 = vmul.f32 %v317_v4, %v140_v7 }
  0x3c   : > { %v142_v11 = vadd.f32 %v317_v4, %v141_v9 }
  0x3e   : > { %v146_v13 = vsel %vm145_vm2, %v317_v4, %v142_v11 }
  0x3f   : > { %v151_v14 = vsel %vm148_vm3, %v150_v10, %v146_v13 }
  0x40   : > { %v153_v15 = vmul.f32 0.5307027, %v151_v14 }
  0x42   : > { %v154_v17 = vadd.f32 -0.72657603, %v153_v15 }
  0x44   : > { %v155_v18 = vmul.f32 %v154_v17, %v151_v14 }
  0x46   : > { %v156_v20 = vadd.f32 0.7107069, %v155_v18 }
  0x48   : > { %v157_v21 = vmul.f32 %v156_v20, %v151_v14 }
  0x4a   : > { %v158_v22 = vadd.f32 -0.14224836, %v157_v21 }
  0x4c   : > { %v159_v23 = vmul.f32 %v158_v22, %v151_v14 }
  0x4e   : > { %v160_v24 = vadd.f32 0.1274148, %v159_v23 }
  0x50   : > { %v161_v26 = vmul.f32 %v160_v24, %v151_v14 }
  0x52   : > { %v166_v27 = vmul.f32 %v319_v25, %v161_v26 }
  0x54   : > { %v168_v28 = vsub.f32 1.0, %v166_v27 }
  0x56   : > { %v169_v29 = vsel %vm167_vm4, %v168_v28, %v166_v27 }
  0x57   : > { %v170_v30 = vmul.f32 %v169_v29, %v134_v0 }
  0x59   : > { %171 = vst [vmem:[%s133_s26] sm:$0xff] %v170_v30 }
  0x5a   : > { %377 = shalt.err (!%p374_p4)
}
  0x5b   : > { %272 = dma.vmem_to_hbm [thread:$0]  (%p478_p11), %s186_s27, 128, %s188_s28, %s173_s10  }
  0x5c PF: > { %s199_s13 = sand.u32 1, %s404_s6   ;;  %p566_p7 = scmp.ge.s32.totalorder %s416_s9, 2 }
  0x5d   : > { %s200_s14 = scalar_lea.sflag [#allocation4], %s199_s13 }
  0x5e   : > { %p279_p5 = pnand %p566_p7, %p482_p12 }
  0x60   : > { %p280_p8 = pneg %p279_p5 }
  0x62   : > { %399 = dma.done.wait (%p280_p8), %s200_s14, 128  }
  0x63   : > { %401 = vsyncadd (%p280_p8), %s200_s14, 4294967168  ;;  %p14_p10 = scmp.ge.s32.totalorder %s453_s12, 4   ;;  %s567_s6 = smov %s408_s7 }
  0x64   : > { %s568_s7 = smov %s412_s8  ;;  %s569_s8 = smov %s465_s15 }
  0x65   : > { %s570_s9 = smov %s453_s12  ;;  %16 = sbr.rel (!%p14_p10) target bundleno = 5 (0x5), region = 69 }
  0x6a   :  { %206 = vsyncpa [#allocation3], 1 }
  0x6b   :  { %208 = vsyncpa [#allocation3 + $0x1], 1 }
  0x6c   :  { %209 = vsyncpa [#allocation4], 1 }
  0x6d   :  { %211 = vsyncpa [#allocation4 + $0x1], 1 }

</bundles_post_ra>
